<compile_context>
chip_gen: v5e
topology: v5e:2x2
jax: 0.10.0
libtpu: 0.0.40
codegen_flags: <defaults>
</compile_context>

<pallas_src>
import functools

import jax
import jax.numpy as jnp
from jax.experimental import pallas as pl
from jax.experimental.pallas import tpu as pltpu


def _round_up(n: int, m: int) -> int:
    return ((n + m - 1) // m) * m


# --------------------------------------------------------------------------- #
# Kernels
# --------------------------------------------------------------------------- #

def _pass1_kernel(x_ref, we_ref, be_ref, lng_ref, lnb_ref, w1_ref, b1_ref,
                  h_ref, sum_ref, ssq_ref):
    """Encoder Linear -> LayerNorm -> Linear1; accumulate BN sum/sumsq per view."""
    t = pl.program_id(1)

    x = x_ref[0]                                              # [TM, Kp] bf16

    # encoder: Linear(input_dim -> embedding_dim), bf16 MXU / f32 accumulate
    z = jnp.dot(x, we_ref[...], preferred_element_type=jnp.float32) + be_ref[...]

    # LayerNorm over features (eps=1e-5, biased var), f32 VPU math
    mu = jnp.mean(z, axis=-1, keepdims=True)
    zc = z - mu
    var = jnp.mean(zc * zc, axis=-1, keepdims=True)
    zn = zc * jax.lax.rsqrt(var + 1e-5) * lng_ref[...] + lnb_ref[...]

    # Linear(embedding_dim -> embedding_dim)
    h = jnp.dot(zn.astype(jnp.bfloat16), w1_ref[...],
                preferred_element_type=jnp.float32) + b1_ref[...]
    h_ref[0] = h

    # BatchNorm1d statistics: accumulate per-feature sum / sumsq over the batch
    # axis (grid axis 1, "arbitrary"); the output block index is constant across
    # it, so the accumulator stays VMEM-resident per view.
    @pl.when(t == 0)
    def _():
        sum_ref[...] = jnp.zeros_like(sum_ref)
        ssq_ref[...] = jnp.zeros_like(ssq_ref)

    sum_ref[0] += jnp.sum(h, axis=0, keepdims=True)
    ssq_ref[0] += jnp.sum(h * h, axis=0, keepdims=True)


def _pass2_kernel(h_ref, sum_ref, ssq_ref, bng_ref, bnb_ref, w2_ref, b2_ref,
                  out_ref, *, inv_batch):
    """BatchNorm (batch stats, biased var) -> ReLU -> Linear2 -> L2 normalize."""
    h = h_ref[0]                                              # [TM, D] f32

    bmu = sum_ref[0] * inv_batch                              # [1, D]
    bvar = jnp.maximum(ssq_ref[0] * inv_batch - bmu * bmu, 0.0)
    hn = (h - bmu) * jax.lax.rsqrt(bvar + 1e-5) * bng_ref[...] + bnb_ref[...]

    hr = jnp.maximum(hn, 0.0)

    p = jnp.dot(hr.astype(jnp.bfloat16), w2_ref[...],
                preferred_element_type=jnp.float32) + b2_ref[...]

    # F.normalize(p, dim=1): rsqrt-multiply (EUP), ||p||^2 clamped at 1e-24
    sq = jnp.sum(p * p, axis=-1, keepdims=True)
    out_ref[0] = p * jax.lax.rsqrt(jnp.maximum(sq, 1e-24))


# --------------------------------------------------------------------------- #
# Wrappers
# --------------------------------------------------------------------------- #

def prepare_params(params, projection_dim):
    """One-time param prep: bf16 matmul weights, lane-padded K / P dims.

    Hoisted out of the per-step forward (per perf review) so padded bf16
    weights are materialized in HBM exactly once.
    """
    f32, bf16 = jnp.float32, jnp.bfloat16
    K, _ = params["w_enc"].shape
    P = projection_dim
    Kp = _round_up(K, 128)
    Pp = _round_up(P, 128)

    we = params["w_enc"].astype(bf16)
    if Kp != K:
        we = jnp.pad(we, ((0, Kp - K), (0, 0)))
    w2 = params["w2"].astype(bf16)
    b2 = params["b2"].astype(f32)
    if Pp != P:
        w2 = jnp.pad(w2, ((0, 0), (0, Pp - P)))   # padded cols stay exactly 0
        b2 = jnp.pad(b2, ((0, 0), (0, Pp - P)))

    return {
        "we": we,
        "be": params["b_enc"].astype(f32),
        "ln_g": params["ln_g"].astype(f32),
        "ln_b": params["ln_b"].astype(f32),
        "w1": params["w1"].astype(bf16),
        "b1": params["b1"].astype(f32),
        "bn_g": params["bn_g"].astype(f32),
        "bn_b": params["bn_b"].astype(f32),
        "w2": w2,
        "b2": b2,
    }


def simclr_forward_views(x_views, prep, projection_dim, batch_tile=None):
    """x_views: [V, B, input_dim] -> [V, B, projection_dim] (L2 row-normalized)."""
    V, B, K = x_views.shape
    Kp, D = prep["we"].shape
    Pp = prep["w2"].shape[1]
    P = projection_dim
    # LayerNorm reduces over the embedding axis, so it must not be zero-padded.
    assert D % 128 == 0, "embedding_dim must be a multiple of 128"

    if batch_tile is None:
        batch_tile = B
        for tm in (512, 256, 128, 64, 32, 16, 8):
            if B % tm == 0:
                batch_tile = tm
                break
    TM = batch_tile
    assert B % TM == 0, "batch must be divisible by batch_tile"
    n_bt = B // TM

    f32, bf16 = jnp.float32, jnp.bfloat16

    # Single fused cast(+pad) of the dominant HBM stream: x ships as bf16; no
    # separate padded f32 copy is ever created.
    xp = x_views.astype(bf16)
    if Kp != K:
        xp = jnp.pad(xp, ((0, 0), (0, 0), (0, Kp - K)))

    # Grid-invariant operands: constant block index, single-buffered (no benefit
    # from double-buffering a constant block -> 1x VMEM instead of 2x).
    const = lambda shape: pl.BlockSpec(shape, lambda v, t: (0, 0),
                                       pipeline_mode=pl.Buffered(1))

    # ------------------------- pass 1 ------------------------- #
    vmem1 = (2 * TM * Kp * 2                    # x block (bf16, double-buffered)
             + (Kp * D + D * D) * 2             # we, w1 (bf16, single-buffered)
             + 4 * D * 4                        # be, ln_g, ln_b, b1
             + 2 * TM * D * 4                   # h output block (double-buffered)
             + 4 * D * 4                        # bn sum / sumsq accumulators
             + 8 * TM * D * 4)                  # f32 intermediates headroom
    vmem1 = int(min(vmem1 + (16 << 20), 64 << 20))

    h, bn_sum, bn_ssq = pl.pallas_call(
        _pass1_kernel,
        out_shape=(jax.ShapeDtypeStruct((V, B, D), f32),
                   jax.ShapeDtypeStruct((V, 1, D), f32),
                   jax.ShapeDtypeStruct((V, 1, D), f32)),
        grid=(V, n_bt),
        in_specs=[
            pl.BlockSpec((1, TM, Kp), lambda v, t: (v, t, 0)),   # x per (view, tile)
            const((Kp, D)),                                      # w_enc
            const((1, D)),                                       # b_enc
            const((1, D)), const((1, D)),                        # ln_g, ln_b
            const((D, D)), const((1, D)),                        # w1, b1
        ],
        out_specs=(
            pl.BlockSpec((1, TM, D), lambda v, t: (v, t, 0)),    # h
            pl.BlockSpec((1, 1, D), lambda v, t: (v, 0, 0)),     # bn sum (accum)
            pl.BlockSpec((1, 1, D), lambda v, t: (v, 0, 0)),     # bn sumsq (accum)
        ),
        compiler_params=pltpu.CompilerParams(
            dimension_semantics=("parallel", "arbitrary"),
            vmem_limit_bytes=vmem1),
        cost_estimate=pl.CostEstimate(
            flops=2 * V * B * (Kp * D + D * D),
            transcendentals=V * B,
            bytes_accessed=(V * B * Kp * 2 + (Kp * D + D * D) * 2
                            + 4 * D * 4 + V * B * D * 4 + 2 * V * D * 4)),
    )(xp, prep["we"], prep["be"], prep["ln_g"], prep["ln_b"],
      prep["w1"], prep["b1"])

    # ------------------------- pass 2 ------------------------- #
    vmem2 = (2 * TM * D * 4                     # h block
             + D * Pp * 2                       # w2 (bf16, single-buffered)
             + (8 * D + 3 * Pp) * 4             # bn stats / params, b2
             + 2 * TM * Pp * 4                  # output block
             + 8 * TM * max(D, Pp) * 4)         # f32 intermediates headroom
    vmem2 = int(min(vmem2 + (16 << 20), 64 << 20))

    out = pl.pallas_call(
        functools.partial(_pass2_kernel, inv_batch=1.0 / float(B)),
        out_shape=jax.ShapeDtypeStruct((V, B, Pp), f32),
        grid=(V, n_bt),
        in_specs=[
            pl.BlockSpec((1, TM, D), lambda v, t: (v, t, 0)),    # h per (view, tile)
            pl.BlockSpec((1, 1, D), lambda v, t: (v, 0, 0)),     # bn sum (per view)
            pl.BlockSpec((1, 1, D), lambda v, t: (v, 0, 0)),     # bn sumsq
            const((1, D)), const((1, D)),                        # bn_g, bn_b
            const((D, Pp)), const((1, Pp)),                      # w2, b2
        ],
        out_specs=pl.BlockSpec((1, TM, Pp), lambda v, t: (v, t, 0)),
        compiler_params=pltpu.CompilerParams(
            dimension_semantics=("parallel", "parallel"),
            vmem_limit_bytes=vmem2),
        cost_estimate=pl.CostEstimate(
            flops=2 * V * B * D * Pp,
            transcendentals=2 * V * B,
            bytes_accessed=(V * B * D * 4 + D * Pp * 2
                            + (4 * D + Pp) * 4 + V * B * Pp * 4)),
    )(h, bn_sum, bn_ssq, prep["bn_g"], prep["bn_b"], prep["w2"], prep["b2"])

    return out if Pp == P else out[:, :, :P]


def simclr_model(x1, x2, prep, projection_dim, batch_tile=None):
    """Mirrors SimCLRModel.forward: returns (h1, h2) or (h1, None)."""
    if x2 is None:
        h = simclr_forward_views(x1[None], prep, projection_dim, batch_tile)
        return h[0], None
    h = simclr_forward_views(jnp.stack([x1, x2], axis=0), prep,
                             projection_dim, batch_tile)
    return h[0], h[1]


# --------------------------------------------------------------------------- #
# Parameters & reference
# --------------------------------------------------------------------------- #

def make_params(key, input_dim, embedding_dim, projection_dim):
    """Deterministic synthetic parameters (not a checkpoint load)."""
    ks = jax.random.split(key, 6)
    f32 = jnp.float32

    def lin(k, fan_in, fan_out):
        scale = 1.0 / jnp.sqrt(jnp.asarray(fan_in, f32))
        return jax.random.normal(k, (fan_in, fan_out), dtype=f32) * scale

    return {
        "w_enc": lin(ks[0], input_dim, embedding_dim),
        "b_enc": jnp.zeros((1, embedding_dim), f32),
        "ln_g": jnp.ones((1, embedding_dim), f32),
        "ln_b": jnp.zeros((1, embedding_dim), f32),
        "w1": lin(ks[1], embedding_dim, embedding_dim),
        "b1": jax.random.normal(ks[2], (1, embedding_dim), dtype=f32) * 0.01,
        "bn_g": jnp.ones((1, embedding_dim), f32),
        "bn_b": jnp.zeros((1, embedding_dim), f32),
        "w2": lin(ks[3], embedding_dim, projection_dim),
        "b2": jax.random.normal(ks[4], (1, projection_dim), dtype=f32) * 0.01,
    }


def _reference_forward(x, params):
    """Pure-JAX f32 reference of encoder + projection head (one view)."""
    z = x @ params["w_enc"] + params["b_enc"]
    mu = jnp.mean(z, axis=-1, keepdims=True)
    var = jnp.mean((z - mu) ** 2, axis=-1, keepdims=True)
    zn = (z - mu) * jax.lax.rsqrt(var + 1e-5) * params["ln_g"] + params["ln_b"]
    h = zn @ params["w1"] + params["b1"]
    bmu = jnp.mean(h, axis=0, keepdims=True)
    bvar = jnp.mean((h - bmu) ** 2, axis=0, keepdims=True)
    hn = (h - bmu) * jax.lax.rsqrt(bvar + 1e-5) * params["bn_g"] + params["bn_b"]
    p = jnp.maximum(hn, 0.0) @ params["w2"] + params["b2"]
    nrm = jnp.maximum(jnp.linalg.norm(p, axis=-1, keepdims=True), 1e-12)
    return p / nrm


if __name__ == "__main__":
    # Small, lane-friendly, config-consistent shapes (scaled-down SimCLRConfig).
    B = 16            # batch (>=2 so BatchNorm1d batch stats are well-defined)
    INPUT_DIM = 256   # scaled-down config.input_dim (2080)
    EMBED_DIM = 128   # scaled-down config.embedding_dim (512), multiple of 128
    PROJ_DIM = 128    # config.projection_dim
    BATCH_TILE = 8    # exercises the batch-tiled two-pass BatchNorm path

    key = jax.random.PRNGKey(0)
    kx1, kx2, kp = jax.random.split(key, 3)
    x1 = jax.random.normal(kx1, (B, INPUT_DIM), dtype=jnp.float32)
    x2 = jax.random.normal(kx2, (B, INPUT_DIM), dtype=jnp.float32)

    params = make_params(kp, INPUT_DIM, EMBED_DIM, PROJ_DIM)
    prep = prepare_params(params, PROJ_DIM)      # one-time weight prep (hoisted)

    fwd = jax.jit(simclr_model, static_argnames=("projection_dim", "batch_tile"))

    h1, h2 = fwd(x1, x2, prep, projection_dim=PROJ_DIM, batch_tile=BATCH_TILE)
    jax.block_until_ready((h1, h2))

    assert h1.shape == (B, PROJ_DIM) and h2.shape == (B, PROJ_DIM)
    # Rows must be unit-norm after F.normalize(dim=1).
    assert jnp.allclose(jnp.linalg.norm(h1, axis=1), 1.0, atol=1e-4)
    assert jnp.allclose(jnp.linalg.norm(h2, axis=1), 1.0, atol=1e-4)
    # Match the f32 reference within bf16-matmul tolerance.
    r1 = _reference_forward(x1, params)
    r2 = _reference_forward(x2, params)
    assert jnp.max(jnp.abs(h1 - r1)) < 5e-2
    assert jnp.max(jnp.abs(h2 - r2)) < 5e-2

    # Single-view path (x2=None) must match the same view from the paired call
    # (BatchNorm stats are per view, so h1 is identical either way).
    hs, none = fwd(x1, None, prep, projection_dim=PROJ_DIM, batch_tile=BATCH_TILE)
    jax.block_until_ready(hs)
    assert none is None
    assert jnp.max(jnp.abs(hs - h1)) < 1e-3

    print("KERNEL_OK")
</pallas_src>

<mosaic_0001>
module attributes {stable_mosaic.version = 11 : i64} {
  func.func @_pass2_kernel(%arg0: i32, %arg1: i32, %arg2: memref<1x8x128xf32, #tpu.memory_space<vmem>>, %arg3: memref<1x1x128xf32, #tpu.memory_space<vmem>>, %arg4: memref<1x1x128xf32, #tpu.memory_space<vmem>>, %arg5: memref<1x128xf32, #tpu.memory_space<vmem>>, %arg6: memref<1x128xf32, #tpu.memory_space<vmem>>, %arg7: memref<128x128xbf16, #tpu.memory_space<vmem>>, %arg8: memref<1x128xf32, #tpu.memory_space<vmem>>, %arg9: memref<1x8x128xf32, #tpu.memory_space<vmem>>) attributes {dimension_semantics = [#tpu.dimension_semantics<parallel>, #tpu.dimension_semantics<parallel>], iteration_bounds = array<i64: 2, 2>, scalar_prefetch = 0 : i64, scratch_operands = 0 : i64, tpu.core_type = #tpu.core_type<tc>, window_params = [{transform_indices = @transform_0, window_bounds = array<i64: 1, 8, 128>}, {transform_indices = @transform_1, window_bounds = array<i64: 1, 1, 128>}, {transform_indices = @transform_2, window_bounds = array<i64: 1, 1, 128>}, {pipeline_mode = #tpu.pipeline_mode<synchronous>, transform_indices = @transform_3, window_bounds = array<i64: 1, 128>}, {pipeline_mode = #tpu.pipeline_mode<synchronous>, transform_indices = @transform_4, window_bounds = array<i64: 1, 128>}, {pipeline_mode = #tpu.pipeline_mode<synchronous>, transform_indices = @transform_5, window_bounds = array<i64: 128, 128>}, {pipeline_mode = #tpu.pipeline_mode<synchronous>, transform_indices = @transform_6, window_bounds = array<i64: 1, 128>}, {transform_indices = @transform_7, window_bounds = array<i64: 1, 8, 128>}]} {
    %c0 = arith.constant 0 : index
    %c0_0 = arith.constant 0 : index
    %c0_1 = arith.constant 0 : index
    %0 = vector.load %arg2[%c0, %c0_0, %c0_1] : memref<1x8x128xf32, #tpu.memory_space<vmem>>, vector<1x8x128xf32>
    %1 = vector.shape_cast %0 : vector<1x8x128xf32> to vector<8x128xf32>
    %c0_2 = arith.constant 0 : index
    %c0_3 = arith.constant 0 : index
    %c0_4 = arith.constant 0 : index
    %2 = vector.load %arg3[%c0_2, %c0_3, %c0_4] : memref<1x1x128xf32, #tpu.memory_space<vmem>>, vector<1x1x128xf32>
    %3 = vector.shape_cast %2 : vector<1x1x128xf32> to vector<1x128xf32>
    %cst = arith.constant 6.250000e-02 : f32
    %4 = vector.broadcast %cst : f32 to vector<1x128xf32>
    %5 = arith.mulf %3, %4 : vector<1x128xf32>
    %c0_5 = arith.constant 0 : index
    %c0_6 = arith.constant 0 : index
    %c0_7 = arith.constant 0 : index
    %6 = vector.load %arg4[%c0_5, %c0_6, %c0_7] : memref<1x1x128xf32, #tpu.memory_space<vmem>>, vector<1x1x128xf32>
    %7 = vector.shape_cast %6 : vector<1x1x128xf32> to vector<1x128xf32>
    %cst_8 = arith.constant 6.250000e-02 : f32
    %8 = vector.broadcast %cst_8 : f32 to vector<1x128xf32>
    %9 = arith.mulf %7, %8 : vector<1x128xf32>
    %10 = arith.mulf %5, %5 : vector<1x128xf32>
    %11 = arith.subf %9, %10 : vector<1x128xf32>
    %cst_9 = arith.constant 0.000000e+00 : f32
    %12 = vector.broadcast %cst_9 : f32 to vector<1x128xf32>
    %13 = arith.maximumf %11, %12 : vector<1x128xf32>
    %14 = vector.broadcast %5 : vector<1x128xf32> to vector<8x128xf32>
    %15 = arith.subf %1, %14 : vector<8x128xf32>
    %cst_10 = arith.constant 9.99999974E-6 : f32
    %16 = vector.broadcast %cst_10 : f32 to vector<1x128xf32>
    %17 = arith.addf %13, %16 : vector<1x128xf32>
    %18 = math.rsqrt %17 : vector<1x128xf32>
    %19 = vector.broadcast %18 : vector<1x128xf32> to vector<8x128xf32>
    %20 = arith.mulf %15, %19 : vector<8x128xf32>
    %c0_11 = arith.constant 0 : index
    %c0_12 = arith.constant 0 : index
    %21 = vector.load %arg5[%c0_11, %c0_12] : memref<1x128xf32, #tpu.memory_space<vmem>>, vector<1x128xf32>
    %22 = vector.broadcast %21 : vector<1x128xf32> to vector<8x128xf32>
    %23 = arith.mulf %20, %22 : vector<8x128xf32>
    %c0_13 = arith.constant 0 : index
    %c0_14 = arith.constant 0 : index
    %24 = vector.load %arg6[%c0_13, %c0_14] : memref<1x128xf32, #tpu.memory_space<vmem>>, vector<1x128xf32>
    %25 = vector.broadcast %24 : vector<1x128xf32> to vector<8x128xf32>
    %26 = arith.addf %23, %25 : vector<8x128xf32>
    %cst_15 = arith.constant 0.000000e+00 : f32
    %27 = vector.broadcast %cst_15 : f32 to vector<8x128xf32>
    %28 = arith.maximumf %26, %27 : vector<8x128xf32>
    %29 = arith.truncf %28 : vector<8x128xf32> to vector<8x128xbf16>
    %c0_16 = arith.constant 0 : index
    %c0_17 = arith.constant 0 : index
    %30 = vector.load %arg7[%c0_16, %c0_17] : memref<128x128xbf16, #tpu.memory_space<vmem>>, vector<128x128xbf16>
    %cst_18 = arith.constant dense<0.000000e+00> : vector<8x128xf32>
    %31 = tpu.matmul %29, %30, %cst_18 {dimension_numbers = #tpu.dot_dimension_numbers<[1], [0], [0], [1], [0, 0, 1, 1], [], []>} : vector<8x128xbf16>, vector<128x128xbf16>, vector<8x128xf32> -> vector<8x128xf32>
    %c0_19 = arith.constant 0 : index
    %c0_20 = arith.constant 0 : index
    %32 = vector.load %arg8[%c0_19, %c0_20] : memref<1x128xf32, #tpu.memory_space<vmem>>, vector<1x128xf32>
    %33 = vector.broadcast %32 : vector<1x128xf32> to vector<8x128xf32>
    %34 = arith.addf %31, %33 : vector<8x128xf32>
    %35 = arith.mulf %34, %34 : vector<8x128xf32>
    %cst_21 = arith.constant dense<0.000000e+00> : vector<8xf32>
    %36 = vector.multi_reduction <add>, %35, %cst_21 [1] : vector<8x128xf32> to vector<8xf32>
    %37 = vector.shape_cast %36 : vector<8xf32> to vector<8x1xf32>
    %cst_22 = arith.constant 1.000000e-24 : f32
    %38 = vector.broadcast %cst_22 : f32 to vector<8x1xf32>
    %39 = arith.maximumf %37, %38 : vector<8x1xf32>
    %40 = math.rsqrt %39 : vector<8x1xf32>
    %41 = vector.broadcast %40 : vector<8x1xf32> to vector<8x128xf32>
    %42 = arith.mulf %34, %41 : vector<8x128xf32>
    %c0_23 = arith.constant 0 : index
    %c0_24 = arith.constant 0 : index
    %c0_25 = arith.constant 0 : index
    %43 = vector.load %arg9[%c0_23, %c0_24, %c0_25] : memref<1x8x128xf32, #tpu.memory_space<vmem>>, vector<1x8x128xf32>
    %44 = vector.shape_cast %43 : vector<1x8x128xf32> to vector<8x128xf32>
    %45 = vector.shape_cast %42 : vector<8x128xf32> to vector<1x8x128xf32>
    tpu.vector_store %arg9[%c0_23, %c0_24, %c0_25], %45 {strides = array<i32>} : memref<1x8x128xf32, #tpu.memory_space<vmem>>, vector<1x8x128xf32>,
    return
  }
  func.func @transform_0(%arg0: i32, %arg1: i32) -> (i32, i32, i32) {
    %c0_i32 = arith.constant 0 : i32
    %c0_i32_0 = arith.constant 0 : i32
    return %arg0, %arg1, %c0_i32 : i32, i32, i32
  }
  func.func @transform_1(%arg0: i32, %arg1: i32) -> (i32, i32, i32) {
    %c0_i32 = arith.constant 0 : i32
    %c0_i32_0 = arith.constant 0 : i32
    %c0_i32_1 = arith.constant 0 : i32
    return %arg0, %c0_i32, %c0_i32_0 : i32, i32, i32
  }
  func.func @transform_2(%arg0: i32, %arg1: i32) -> (i32, i32, i32) {
    %c0_i32 = arith.constant 0 : i32
    %c0_i32_0 = arith.constant 0 : i32
    %c0_i32_1 = arith.constant 0 : i32
    return %arg0, %c0_i32, %c0_i32_0 : i32, i32, i32
  }
  func.func @transform_3(%arg0: i32, %arg1: i32) -> (i32, i32) {
    %c0_i32 = arith.constant 0 : i32
    %c0_i32_0 = arith.constant 0 : i32
    %c0_i32_1 = arith.constant 0 : i32
    return %c0_i32, %c0_i32_0 : i32, i32
  }
  func.func @transform_4(%arg0: i32, %arg1: i32) -> (i32, i32) {
    %c0_i32 = arith.constant 0 : i32
    %c0_i32_0 = arith.constant 0 : i32
    %c0_i32_1 = arith.constant 0 : i32
    return %c0_i32, %c0_i32_0 : i32, i32
  }
  func.func @transform_5(%arg0: i32, %arg1: i32) -> (i32, i32) {
    %c0_i32 = arith.constant 0 : i32
    %c0_i32_0 = arith.constant 0 : i32
    %c0_i32_1 = arith.constant 0 : i32
    return %c0_i32, %c0_i32_0 : i32, i32
  }
  func.func @transform_6(%arg0: i32, %arg1: i32) -> (i32, i32) {
    %c0_i32 = arith.constant 0 : i32
    %c0_i32_0 = arith.constant 0 : i32
    %c0_i32_1 = arith.constant 0 : i32
    return %c0_i32, %c0_i32_0 : i32, i32
  }
  func.func @transform_7(%arg0: i32, %arg1: i32) -> (i32, i32, i32) {
    %c0_i32 = arith.constant 0 : i32
    %c0_i32_0 = arith.constant 0 : i32
    return %arg0, %arg1, %c0_i32 : i32, i32, i32
  }
}

module attributes {stable_mosaic.version = 11 : i64} {
  func.func @_pass1_kernel(%arg0: i32, %arg1: i32, %arg2: memref<1x8x256xbf16, #tpu.memory_space<vmem>>, %arg3: memref<256x128xbf16, #tpu.memory_space<vmem>>, %arg4: memref<1x128xf32, #tpu.memory_space<vmem>>, %arg5: memref<1x128xf32, #tpu.memory_space<vmem>>, %arg6: memref<1x128xf32, #tpu.memory_space<vmem>>, %arg7: memref<128x128xbf16, #tpu.memory_space<vmem>>, %arg8: memref<1x128xf32, #tpu.memory_space<vmem>>, %arg9: memref<1x8x128xf32, #tpu.memory_space<vmem>>, %arg10: memref<1x1x128xf32, #tpu.memory_space<vmem>>, %arg11: memref<1x1x128xf32, #tpu.memory_space<vmem>>) attributes {dimension_semantics = [#tpu.dimension_semantics<parallel>, #tpu.dimension_semantics<arbitrary>], iteration_bounds = array<i64: 2, 2>, scalar_prefetch = 0 : i64, scratch_operands = 0 : i64, tpu.core_type = #tpu.core_type<tc>, window_params = [{transform_indices = @transform_0, window_bounds = array<i64: 1, 8, 256>}, {pipeline_mode = #tpu.pipeline_mode<synchronous>, transform_indices = @transform_1, window_bounds = array<i64: 256, 128>}, {pipeline_mode = #tpu.pipeline_mode<synchronous>, transform_indices = @transform_2, window_bounds = array<i64: 1, 128>}, {pipeline_mode = #tpu.pipeline_mode<synchronous>, transform_indices = @transform_3, window_bounds = array<i64: 1, 128>}, {pipeline_mode = #tpu.pipeline_mode<synchronous>, transform_indices = @transform_4, window_bounds = array<i64: 1, 128>}, {pipeline_mode = #tpu.pipeline_mode<synchronous>, transform_indices = @transform_5, window_bounds = array<i64: 128, 128>}, {pipeline_mode = #tpu.pipeline_mode<synchronous>, transform_indices = @transform_6, window_bounds = array<i64: 1, 128>}, {transform_indices = @transform_7, window_bounds = array<i64: 1, 8, 128>}, {transform_indices = @transform_8, window_bounds = array<i64: 1, 1, 128>}, {transform_indices = @transform_9, window_bounds = array<i64: 1, 1, 128>}]} {
    %c0 = arith.constant 0 : index
    %c0_0 = arith.constant 0 : index
    %c0_1 = arith.constant 0 : index
    %0 = vector.load %arg2[%c0, %c0_0, %c0_1] : memref<1x8x256xbf16, #tpu.memory_space<vmem>>, vector<1x8x256xbf16>
    %1 = vector.shape_cast %0 : vector<1x8x256xbf16> to vector<8x256xbf16>
    %c0_2 = arith.constant 0 : index
    %c0_3 = arith.constant 0 : index
    %2 = vector.load %arg3[%c0_2, %c0_3] : memref<256x128xbf16, #tpu.memory_space<vmem>>, vector<256x128xbf16>
    %cst = arith.constant dense<0.000000e+00> : vector<8x128xf32>
    %3 = tpu.matmul %1, %2, %cst {dimension_numbers = #tpu.dot_dimension_numbers<[1], [0], [0], [1], [0, 0, 1, 1], [], []>} : vector<8x256xbf16>, vector<256x128xbf16>, vector<8x128xf32> -> vector<8x128xf32>
    %c0_4 = arith.constant 0 : index
    %c0_5 = arith.constant 0 : index
    %4 = vector.load %arg4[%c0_4, %c0_5] : memref<1x128xf32, #tpu.memory_space<vmem>>, vector<1x128xf32>
    %5 = vector.broadcast %4 : vector<1x128xf32> to vector<8x128xf32>
    %6 = arith.addf %3, %5 : vector<8x128xf32>
    %cst_6 = arith.constant dense<0.000000e+00> : vector<8xf32>
    %7 = vector.multi_reduction <add>, %6, %cst_6 [1] : vector<8x128xf32> to vector<8xf32>
    %8 = vector.shape_cast %7 : vector<8xf32> to vector<8x1xf32>
    %cst_7 = arith.constant 1.280000e+02 : f32
    %9 = vector.broadcast %cst_7 : f32 to vector<8x1xf32>
    %10 = arith.divf %8, %9 : vector<8x1xf32>
    %11 = vector.broadcast %10 : vector<8x1xf32> to vector<8x128xf32>
    %12 = arith.subf %6, %11 : vector<8x128xf32>
    %13 = arith.mulf %12, %12 : vector<8x128xf32>
    %cst_8 = arith.constant dense<0.000000e+00> : vector<8xf32>
    %14 = vector.multi_reduction <add>, %13, %cst_8 [1] : vector<8x128xf32> to vector<8xf32>
    %15 = vector.shape_cast %14 : vector<8xf32> to vector<8x1xf32>
    %cst_9 = arith.constant 1.280000e+02 : f32
    %16 = vector.broadcast %cst_9 : f32 to vector<8x1xf32>
    %17 = arith.divf %15, %16 : vector<8x1xf32>
    %cst_10 = arith.constant 9.99999974E-6 : f32
    %18 = vector.broadcast %cst_10 : f32 to vector<8x1xf32>
    %19 = arith.addf %17, %18 : vector<8x1xf32>
    %20 = math.rsqrt %19 : vector<8x1xf32>
    %21 = vector.broadcast %20 : vector<8x1xf32> to vector<8x128xf32>
    %22 = arith.mulf %12, %21 : vector<8x128xf32>
    %c0_11 = arith.constant 0 : index
    %c0_12 = arith.constant 0 : index
    %23 = vector.load %arg5[%c0_11, %c0_12] : memref<1x128xf32, #tpu.memory_space<vmem>>, vector<1x128xf32>
    %24 = vector.broadcast %23 : vector<1x128xf32> to vector<8x128xf32>
    %25 = arith.mulf %22, %24 : vector<8x128xf32>
    %c0_13 = arith.constant 0 : index
    %c0_14 = arith.constant 0 : index
    %26 = vector.load %arg6[%c0_13, %c0_14] : memref<1x128xf32, #tpu.memory_space<vmem>>, vector<1x128xf32>
    %27 = vector.broadcast %26 : vector<1x128xf32> to vector<8x128xf32>
    %28 = arith.addf %25, %27 : vector<8x128xf32>
    %29 = arith.truncf %28 : vector<8x128xf32> to vector<8x128xbf16>
    %c0_15 = arith.constant 0 : index
    %c0_16 = arith.constant 0 : index
    %30 = vector.load %arg7[%c0_15, %c0_16] : memref<128x128xbf16, #tpu.memory_space<vmem>>, vector<128x128xbf16>
    %cst_17 = arith.constant dense<0.000000e+00> : vector<8x128xf32>
    %31 = tpu.matmul %29, %30, %cst_17 {dimension_numbers = #tpu.dot_dimension_numbers<[1], [0], [0], [1], [0, 0, 1, 1], [], []>} : vector<8x128xbf16>, vector<128x128xbf16>, vector<8x128xf32> -> vector<8x128xf32>
    %c0_18 = arith.constant 0 : index
    %c0_19 = arith.constant 0 : index
    %32 = vector.load %arg8[%c0_18, %c0_19] : memref<1x128xf32, #tpu.memory_space<vmem>>, vector<1x128xf32>
    %33 = vector.broadcast %32 : vector<1x128xf32> to vector<8x128xf32>
    %34 = arith.addf %31, %33 : vector<8x128xf32>
    %c0_20 = arith.constant 0 : index
    %c0_21 = arith.constant 0 : index
    %c0_22 = arith.constant 0 : index
    %35 = vector.load %arg9[%c0_20, %c0_21, %c0_22] : memref<1x8x128xf32, #tpu.memory_space<vmem>>, vector<1x8x128xf32>
    %36 = vector.shape_cast %35 : vector<1x8x128xf32> to vector<8x128xf32>
    %37 = vector.shape_cast %34 : vector<8x128xf32> to vector<1x8x128xf32>
    tpu.vector_store %arg9[%c0_20, %c0_21, %c0_22], %37 {strides = array<i32>} : memref<1x8x128xf32, #tpu.memory_space<vmem>>, vector<1x8x128xf32>,
    %c0_i32 = arith.constant 0 : i32
    %38 = arith.cmpi eq, %arg1, %c0_i32 : i32
    %39 = arith.extui %38 : i1 to i32
    %c0_i32_23 = arith.constant 0 : i32
    %40 = arith.cmpi ne, %39, %c0_i32_23 : i32
    scf.if %40 {
      %cst_38 = arith.constant 0.000000e+00 : f32
      %58 = vector.broadcast %cst_38 : f32 to vector<1x1x128xf32>
      %c0_39 = arith.constant 0 : index
      %c0_40 = arith.constant 0 : index
      %c0_41 = arith.constant 0 : index
      %59 = vector.load %arg10[%c0_39, %c0_40, %c0_41] : memref<1x1x128xf32, #tpu.memory_space<vmem>>, vector<1x1x128xf32>
      tpu.vector_store %arg10[%c0_39, %c0_40, %c0_41], %58 {strides = array<i32>} : memref<1x1x128xf32, #tpu.memory_space<vmem>>, vector<1x1x128xf32>,
      %cst_42 = arith.constant 0.000000e+00 : f32
      %60 = vector.broadcast %cst_42 : f32 to vector<1x1x128xf32>
      %c0_43 = arith.constant 0 : index
      %c0_44 = arith.constant 0 : index
      %c0_45 = arith.constant 0 : index
      %61 = vector.load %arg11[%c0_43, %c0_44, %c0_45] : memref<1x1x128xf32, #tpu.memory_space<vmem>>, vector<1x1x128xf32>
      tpu.vector_store %arg11[%c0_43, %c0_44, %c0_45], %60 {strides = array<i32>} : memref<1x1x128xf32, #tpu.memory_space<vmem>>, vector<1x1x128xf32>,
    } else {
    }
    %c0_24 = arith.constant 0 : index
    %c0_25 = arith.constant 0 : index
    %c0_26 = arith.constant 0 : index
    %41 = vector.load %arg10[%c0_24, %c0_25, %c0_26] : memref<1x1x128xf32, #tpu.memory_space<vmem>>, vector<1x1x128xf32>
    %42 = vector.shape_cast %41 : vector<1x1x128xf32> to vector<1x128xf32>
    %cst_27 = arith.constant dense<0.000000e+00> : vector<128xf32>
    %43 = vector.multi_reduction <add>, %34, %cst_27 [0] : vector<8x128xf32> to vector<128xf32>
    %44 = vector.shape_cast %43 : vector<128xf32> to vector<1x128xf32>
    %45 = arith.addf %42, %44 : vector<1x128xf32>
    %c0_28 = arith.constant 0 : index
    %c0_29 = arith.constant 0 : index
    %c0_30 = arith.constant 0 : index
    %46 = vector.load %arg10[%c0_28, %c0_29, %c0_30] : memref<1x1x128xf32, #tpu.memory_space<vmem>>, vector<1x1x128xf32>
    %47 = vector.shape_cast %46 : vector<1x1x128xf32> to vector<1x128xf32>
    %48 = vector.shape_cast %45 : vector<1x128xf32> to vector<1x1x128xf32>
    tpu.vector_store %arg10[%c0_28, %c0_29, %c0_30], %48 {strides = array<i32>} : memref<1x1x128xf32, #tpu.memory_space<vmem>>, vector<1x1x128xf32>,
    %c0_31 = arith.constant 0 : index
    %c0_32 = arith.constant 0 : index
    %c0_33 = arith.constant 0 : index
    %49 = vector.load %arg11[%c0_31, %c0_32, %c0_33] : memref<1x1x128xf32, #tpu.memory_space<vmem>>, vector<1x1x128xf32>
    %50 = vector.shape_cast %49 : vector<1x1x128xf32> to vector<1x128xf32>
    %51 = arith.mulf %34, %34 : vector<8x128xf32>
    %cst_34 = arith.constant dense<0.000000e+00> : vector<128xf32>
    %52 = vector.multi_reduction <add>, %51, %cst_34 [0] : vector<8x128xf32> to vector<128xf32>
    %53 = vector.shape_cast %52 : vector<128xf32> to vector<1x128xf32>
    %54 = arith.addf %50, %53 : vector<1x128xf32>
    %c0_35 = arith.constant 0 : index
    %c0_36 = arith.constant 0 : index
    %c0_37 = arith.constant 0 : index
    %55 = vector.load %arg11[%c0_35, %c0_36, %c0_37] : memref<1x1x128xf32, #tpu.memory_space<vmem>>, vector<1x1x128xf32>
    %56 = vector.shape_cast %55 : vector<1x1x128xf32> to vector<1x128xf32>
    %57 = vector.shape_cast %54 : vector<1x128xf32> to vector<1x1x128xf32>
    tpu.vector_store %arg11[%c0_35, %c0_36, %c0_37], %57 {strides = array<i32>} : memref<1x1x128xf32, #tpu.memory_space<vmem>>, vector<1x1x128xf32>,
    return
  }
  func.func @transform_0(%arg0: i32, %arg1: i32) -> (i32, i32, i32) {
    %c0_i32 = arith.constant 0 : i32
    %c0_i32_0 = arith.constant 0 : i32
    return %arg0, %arg1, %c0_i32 : i32, i32, i32
  }
  func.func @transform_1(%arg0: i32, %arg1: i32) -> (i32, i32) {
    %c0_i32 = arith.constant 0 : i32
    %c0_i32_0 = arith.constant 0 : i32
    %c0_i32_1 = arith.constant 0 : i32
    return %c0_i32, %c0_i32_0 : i32, i32
  }
  func.func @transform_2(%arg0: i32, %arg1: i32) -> (i32, i32) {
    %c0_i32 = arith.constant 0 : i32
    %c0_i32_0 = arith.constant 0 : i32
    %c0_i32_1 = arith.constant 0 : i32
    return %c0_i32, %c0_i32_0 : i32, i32
  }
  func.func @transform_3(%arg0: i32, %arg1: i32) -> (i32, i32) {
    %c0_i32 = arith.constant 0 : i32
    %c0_i32_0 = arith.constant 0 : i32
    %c0_i32_1 = arith.constant 0 : i32
    return %c0_i32, %c0_i32_0 : i32, i32
  }
  func.func @transform_4(%arg0: i32, %arg1: i32) -> (i32, i32) {
    %c0_i32 = arith.constant 0 : i32
    %c0_i32_0 = arith.constant 0 : i32
    %c0_i32_1 = arith.constant 0 : i32
    return %c0_i32, %c0_i32_0 : i32, i32
  }
  func.func @transform_5(%arg0: i32, %arg1: i32) -> (i32, i32) {
    %c0_i32 = arith.constant 0 : i32
    %c0_i32_0 = arith.constant 0 : i32
    %c0_i32_1 = arith.constant 0 : i32
    return %c0_i32, %c0_i32_0 : i32, i32
  }
  func.func @transform_6(%arg0: i32, %arg1: i32) -> (i32, i32) {
    %c0_i32 = arith.constant 0 : i32
    %c0_i32_0 = arith.constant 0 : i32
    %c0_i32_1 = arith.constant 0 : i32
    return %c0_i32, %c0_i32_0 : i32, i32
  }
  func.func @transform_7(%arg0: i32, %arg1: i32) -> (i32, i32, i32) {
    %c0_i32 = arith.constant 0 : i32
    %c0_i32_0 = arith.constant 0 : i32
    return %arg0, %arg1, %c0_i32 : i32, i32, i32
  }
  func.func @transform_8(%arg0: i32, %arg1: i32) -> (i32, i32, i32) {
    %c0_i32 = arith.constant 0 : i32
    %c0_i32_0 = arith.constant 0 : i32
    %c0_i32_1 = arith.constant 0 : i32
    return %arg0, %c0_i32, %c0_i32_0 : i32, i32, i32
  }
  func.func @transform_9(%arg0: i32, %arg1: i32) -> (i32, i32, i32) {
    %c0_i32 = arith.constant 0 : i32
    %c0_i32_0 = arith.constant 0 : i32
    %c0_i32_1 = arith.constant 0 : i32
    return %arg0, %c0_i32, %c0_i32_0 : i32, i32, i32
  }
}

</mosaic_0001>

<bundles_post_ra>
// kernel: simclr_model.3
= control target key start
LH: loop header
LB: loop body
LE: loop exit
PB: predicated region body
PF: predicated region fallthrough
CT: control target
= control target key end

     0   :  { %s756_s24 = smov 0   ;;  %s758_s25 = smov 0   ;;  %s857_s0 = inlined_call_operand.vmem [shape: f32[2,16,128], index: 0, kind: input, shape index: {}]   ;;  %s858_s1 = inlined_call_operand.vmem [shape: f32[2,1,128], index: 1, kind: input, shape index: {}]   ;;  %s859_s2 = inlined_call_operand.vmem [shape: f32[2,1,128], index: 2, kind: input, shape index: {}]   ;;  %s860_s3 = inlined_call_operand.vmem [shape: f32[1,128], index: 3, kind: input, shape index: {}]   ;;  %s861_s4 = inlined_call_operand.vmem [shape: f32[1,128], index: 4, kind: input, shape index: {}]   ;;  %s862_s5 = inlined_call_operand.vmem [shape: bf16[128,128], index: 5, kind: input, shape index: {}]   ;;  %s863_s6 = inlined_call_operand.vmem [shape: f32[1,128], index: 6, kind: input, shape index: {}]   ;;  %s864_s7 = inlined_call_operand.vmem [shape: f32[2,16,128], index: 7, kind: output, shape index: {}]  }
   0x1   :  { %s760_s26 = smov 0   ;;  %s762_s27 = smov 0  }
   0x2   :  { %s764_s28 = smov 0  }
   0x3 LB: > { %s26_s29 = sadd.s32 1, %s706_s26  ;;  %s29_s30 = sadd.s32 1, %s710_s27  ;;  %s714_s28 = sphi %s764_s28, %s17_s28   ;;  %s710_s27 = sphi %s762_s27, %s868_s27   ;;  %s706_s26 = sphi %s760_s26, %s867_s26   ;;  %s702_s25 = sphi %s758_s25, %s866_s25   ;;  %s698_s24 = sphi %s756_s24, %s865_s24  }
   0x4   : > { %p27_p0 = scmp.ge.s32.totalorder %s26_s29, 2  ;;  %p582_p1 = scmp.ge.s32.totalorder %s714_s28, 1 }
   0x5   : > { %p272_p2 = scmp.lt.s32.totalorder %s714_s28, 5 }
   0x6   : > { %s870_s29 = smov (%p27_p0, %s26_s29), 0  ;;  %s872_s30 = smov (!%p27_p0, %s29_s30), %s710_s27 }
   0x7   : > { %p273_p3 = pnand %p582_p1, %p272_p2  ;;  %p31_p4 = scmp.ge.s32.totalorder %s872_s30, 2 }
   0x8   : > { %p316_p5 = scmp.lt.s32.totalorder (!%p273_p3), %s702_s25, 1  ;;  %p318_p6 = scmp.lt.s32.totalorder (!%p273_p3), %s698_s24, 1 }
   0x9   : > { %s874_s30 = smov (%p31_p4, %s872_s30), 0  ;;  %276 = sbr.rel (%p273_p3) target bundleno = 326 (0x146), region = 48 }
   0xe   : > { %v628_v0 = vld [vmem:[%s862_s5 + $0x38] sm:$0xff]  ;;  %v627_v1 = vld [vmem:[%s862_s5 + $0x30] sm:$0xff]  ;;  %s876_s25 = smov (!%p316_p5, %s702_s25), 1  ;;  %v626_v3 = vld [vmem:[%s862_s5 + $0x28] sm:$0xff]  ;;  %s878_s24 = smov (!%p318_p6, %s698_s24), 1 }
   0xf   : > { %445 = vmatpush.bf16.msra.mxu0 %v628_v0  ;;  %s326_s14 = scalar_lea.vmem %s858_s1, %s876_s25  ;;  %s329_s17 = scalar_lea.vmem %s859_s2, %s876_s25  ;;  %v625_v8 = vld [vmem:[%s862_s5 + $0x20] sm:$0xff]  ;;  %v624_v11 = vld [vmem:[%s862_s5 + $0x18] sm:$0xff]  ;;  %v623_v13 = vld [vmem:[%s862_s5 + $0x10] sm:$0xff] }
  0x10   : > { %v339_v2 = vld [vmem:[%s326_s14] sm:$0x1]  ;;  %s583_s8 = sshll.u32 %s876_s25, 1  ;;  %v622_v15 = vld [vmem:[%s862_s5 + $0x8] sm:$0xff] }
  0x11   : > { %v340_v4 = vmul.f32 0.0625, %v339_v2  ;;  %v341_v5 = vld [vmem:[%s329_s17] sm:$0x1]  ;;  %s814_s11 = sadd.s32 %s583_s8, %s878_s24 }
  0x12   : > { %v342_v6 = vmul.f32 0.0625, %v341_v5  ;;  %s584_s14 = sshll.u32 %s814_s11, 3  ;;  %v621_v18 = vld [vmem:[%s862_s5] sm:$0xff] }
  0x13   : > { %446 = vmatpush.bf16.msra.mxu0 %v627_v1  ;;  %v343_v7 = vmul.f32 %v340_v4, %v340_v4  ;;  %s323_s17 = scalar_lea.vmem %s857_s0, %s584_s14  ;;  %v347_v20 = vperm.slane %v340_v4, 0  ;;  %v669_v27 = vld [vmem:[%s860_s3] ss:$0 sm:$0xff]  ;;  %s337_s10 = scalar_lea.vmem %s864_s7, %s584_s14 }
  0x14   : > { %v338_v21 = vld [vmem:[%s323_s17] sm:$0xff] }
  0x15   : > { %v344_v9 = vsub.f32 %v342_v6, %v343_v7  ;;  %v349_v24 = vsub.f32 %v338_v21, %v347_v20  ;;  %v670_v29 = vld [vmem:[%s861_s4] ss:$0 sm:$0xff] }
  0x16   : > { %v671_v34 = vld [vmem:[%s863_s6] ss:$0 sm:$0xff] }
  0x17   : > { %447 = vmatpush.bf16.msra.mxu0 %v626_v3  ;;  %v345_v10 = vmax.f32 %v344_v9, 0.0 }
  0x19   : > { %v350_v12 = vadd.f32 1e-05, %v345_v10 }
  0x1b   : > { %448 = vmatpush.bf16.msra.mxu0 %v625_v8  ;;  %672 = vrsqrt.f32 %v350_v12  ;;  %vm357_vm0 = vweird.f32 %v350_v12 }
  0x1f   : > { %449 = vmatpush.bf16.msra.mxu0 %v624_v11 }
  0x21   : > { %v673_v14 = vpop.eup %672 }
  0x22   : > { %v352_v16 = vmul.f32 %v673_v14, %v350_v12  ;;  %vm358_vm1 = vweird.f32 %v673_v14 }
  0x23   : > { %450 = vmatpush.bf16.msra.mxu0 %v623_v13  ;;  %vm359_vm2 = vmor %vm357_vm0, %vm358_vm1 }
  0x24   : > { %v353_v17 = vmul.f32 %v673_v14, %v352_v16 }
  0x26   : > { %v354_v19 = vmul.f32 0.5, %v353_v17 }
  0x27   : > { %451 = vmatpush.bf16.msra.mxu0 %v622_v15 }
  0x28   : > { %v355_v22 = vsub.f32 1.5, %v354_v19 }
  0x2a   : > { %v356_v23 = vmul.f32 %v673_v14, %v355_v22 }
  0x2b   : > { %452 = vmatpush.bf16.msra.mxu0 %v621_v18 }
  0x2c   : > { %v360_v25 = vsel %vm359_vm2, %v673_v14, %v356_v23 }
  0x2d   : > { %v362_v26 = vperm.slane %v360_v25, 0 }
  0x2f   : > { %v364_v28 = vmul.f32 %v362_v26, %v349_v24 }
  0x31   : > { %v369_v30 = vmul.f32 %v669_v27, %v364_v28 }
  0x33   : > { %v374_v31 = vadd.f32 %v670_v29, %v369_v30 }
  0x35   : > { %v375_v32 = vmax.f32 %v374_v31, 0.0 }
  0x37   : > { %v376_v33 = vpack.c.bf16 %v375_v32, %v375_v32 }
  0x39   : > { %453 = vmatmul.bf16.vlgmr.msra.gmra.mxu0 %v376_v33 }
  0xb6   : > { %v454_v35 = vpop.f32.mrf.mxu0 }
  0xb7   : > { %v455_v36 = vadd.f32 %v671_v34, %v454_v35 }
  0xb9   : > { %v458_v37 = vmul.f32 %v455_v36, %v455_v36 }
  0xbb   : > { %459 = vadd.xlane.f32.xlu0 %v458_v37 }
  0xbe   : > { %v456_v38 = vpop.f32.mrf.mxu0 }
 0x12e   : > { %v460_v39 = vpop.xlane.xlu0 %459 }
 0x12f   : > { %v461_v40 = vmax.f32 %v460_v39, 1e-24 }
 0x131   : > { %674 = vrsqrt.f32 %v461_v40  ;;  %vm468_vm4 = vweird.f32 %v461_v40 }
 0x137   : > { %v675_v41 = vpop.eup %674 }
 0x138   : > { %v463_v42 = vmul.f32 %v675_v41, %v461_v40  ;;  %vm469_vm3 = vweird.f32 %v675_v41 }
 0x139   : > { %vm470_vm5 = vmor %vm468_vm4, %vm469_vm3 }
 0x13a   : > { %v464_v43 = vmul.f32 %v675_v41, %v463_v42 }
 0x13c   : > { %v465_v44 = vmul.f32 0.5, %v464_v43 }
 0x13e   : > { %v466_v45 = vsub.f32 1.5, %v465_v44 }
 0x140   : > { %v467_v46 = vmul.f32 %v675_v41, %v466_v45 }
 0x142   : > { %v471_v47 = vsel %vm470_vm5, %v675_v41, %v467_v46 }
 0x143   : > { %v472_v48 = vmul.f32 %v471_v47, %v455_v36 }
 0x145   : > { %473 = vst [vmem:[%s337_s10] sm:$0xff] %v472_v48 }
 0x146 PF: > { %s17_s28 = sadd.s32 1, %s714_s28   ;;  %s865_s24 = smov %s706_s26 }
 0x147   : > { %p14_p7 = scmp.ge.s32.totalorder %s17_s28, 6   ;;  %s866_s25 = smov %s710_s27 }
 0x148   : > { %s867_s26 = smov %s870_s29  ;;  %s868_s27 = smov %s874_s30 }
 0x149   :  { %16 = sbr.rel (!%p14_p7) target bundleno = 3 (0x3), region = 84 }

// kernel: simclr_model.2
= control target key start
LH: loop header
LB: loop body
LE: loop exit
PB: predicated region body
PF: predicated region fallthrough
CT: control target
= control target key end

     0   :  { %s1359_s0 = inlined_call_operand.vmem [shape: bf16[2,16,256], index: 0, kind: input, shape index: {}]   ;;  %s1360_s1 = inlined_call_operand.vmem [shape: bf16[256,128], index: 1, kind: input, shape index: {}]   ;;  %s1361_s2 = inlined_call_operand.vmem [shape: f32[1,128], index: 2, kind: input, shape index: {}]   ;;  %s1362_s3 = inlined_call_operand.vmem [shape: f32[1,128], index: 3, kind: input, shape index: {}]   ;;  %s1363_s4 = inlined_call_operand.vmem [shape: f32[1,128], index: 4, kind: input, shape index: {}]   ;;  %s1364_s5 = inlined_call_operand.hbm [shape: bf16[128,128], index: 5, kind: input, shape index: {}]   ;;  %s1365_s6 = inlined_call_operand.vmem [shape: f32[1,128], index: 6, kind: input, shape index: {}]   ;;  %s1366_s7 = inlined_call_operand.vmem [shape: f32[2,16,128], index: 7, kind: output, shape index: {0}]   ;;  %s1367_s8 = inlined_call_operand.vmem [shape: f32[2,1,128], index: 8, kind: output, shape index: {1}]   ;;  %s1368_s9 = inlined_call_operand.vmem [shape: f32[2,1,128], index: 9, kind: output, shape index: {2}]  }
   0x1   :  { %1369 = sst [smem:[#allocation5_spill]] %s1364_s5 }
   0x2   :  { %15 = vsyncpa [#allocation3], 0  ;;  %s1191_s30 = smov 0   ;;  %s1193_s10 = smov 0  }
   0x3   :  { %s1195_s11 = smov 0   ;;  %s1197_s12 = smov 0  }
   0x4   :  { %s1199_s13 = smov 0  }
   0x5 LB: > { %s864_s14 = sadd.s32 4294967295, %s1134_s13   ;;  %s30_s15 = sadd.s32 1, %s1126_s11  ;;  %s1134_s13 = sphi %s1199_s13, %s21_s13   ;;  %s1130_s12 = sphi %s1197_s12, %s1376_s12   ;;  %s1126_s11 = sphi %s1195_s11, %s1375_s11   ;;  %s1122_s10 = sphi %s1193_s10, %s1374_s10   ;;  %s1118_s30 = sphi %s1191_s30, %s1373_s30  }
   0x6   : > { %p31_p0 = scmp.ge.s32.totalorder %s30_s15, 2  ;;  %s33_s16 = sadd.s32 1, %s1130_s12 }
   0x7   : > { %p866_p1 = scmp.ge.s32.totalorder %s1134_s13, 1  ;;  %p272_p2 = scmp.lt.s32.totalorder %s1134_s13, 5 }
   0x8   : > { %s1378_s15 = smov (%p31_p0, %s30_s15), 0  ;;  %s1380_s16 = smov (!%p31_p0, %s33_s16), %s1130_s12 }
   0x9   : > { %p1224_p3 = pnand %p866_p1, %p272_p2  ;;  %p35_p4 = scmp.ge.s32.totalorder %s1380_s16, 2 }
   0xa   : > { %p1228_p5 = scmp.eq.s32.totalorder %s864_s14, 0  ;;  %s1372_s5 = sld [smem:[#allocation5_spill]] }
   0xb   : > { %p1003_p6 = pneg %p1224_p3  ;;  %s1382_s16 = smov (%p35_p4, %s1380_s16), 0 }
   0xc   : > { %s1136_s22 = smov [#allocation2]   ;;  %s1137_s24 = smov 64  }
   0xd   : > { %s297_s23 = sshll.u32 %s1136_s22, 4  ;;  %p1004_p7 = pnand %p1228_p5, %p1003_p6  ;;  %s298_s23 = int_to_ptr.vmem [resolvable:$true] %s297_s23 }
   0xe   : > { %s1138_s25 = smov 4   ;;  %328 = sbr.rel (%p1224_p3) target bundleno = 610 (0x262), region = 48 }
  0x10   : > { %s295_s21 = sshll.u32 %s1372_s5, 4  ;;  %s296_s21 = int_to_ptr.hbm [resolvable:$true] %s295_s21 }
  0x11   : > { %1006 = dma.hbm_to_vmem [thread:$0]  (!%p1004_p7), %s296_s21, 1024, %s298_s23, [#allocation3], %s1137_s24, %s1137_s24, %s1138_s25  }
  0x13   : > { %1113 = dma.done.wait (%p1228_p5), [#allocation3], 1024  }
  0x14   : > { %1115 = vsyncadd (%p1228_p5), [#allocation3], 4294966272  ;;  %p378_p8 = scmp.lt.s32.totalorder %s1122_s10, 1  ;;  %v982_v0 = vld [vmem:[%s1360_s1 + $0x38] sm:$0xff]  ;;  %v981_v2 = vld [vmem:[%s1360_s1 + $0x30] sm:$0xff]  ;;  %p380_p9 = scmp.lt.s32.totalorder %s1118_s30, 1 }
  0x15   : > { %v990_v1 = vld [vmem:[%s1360_s1 + $0x78] sm:$0xff]  ;;  %541 = vmatpush.bf16.msra.mxu0 %v982_v0  ;;  %v989_v3 = vld [vmem:[%s1360_s1 + $0x70] sm:$0xff]  ;;  %v980_v4 = vld [vmem:[%s1360_s1 + $0x28] sm:$0xff]  ;;  %v1139_v28 = vmov 128.0   ;;  %p972_p10 = scmp.ne.s32.totalorder %s1118_s30, 0 }
  0x16   : > { %s1384_s10 = smov (!%p378_p8, %s1122_s10), 1  ;;  %554 = vmatpush.bf16.msra.mxu1 %v990_v1  ;;  %v988_v5 = vld [vmem:[%s1360_s1 + $0x68] sm:$0xff]  ;;  %v979_v6 = vld [vmem:[%s1360_s1 + $0x20] sm:$0xff]  ;;  %v978_v8 = vld [vmem:[%s1360_s1 + $0x18] sm:$0xff]  ;;  %1058 = vrcp.f32 %v1139_v28 }
  0x17   : > { %s1255_s28 = scalar_lea.vmem %s1367_s8, %s1384_s10  ;;  %s1261_s17 = scalar_lea.vmem %s1368_s9, %s1384_s10  ;;  %v987_v7 = vld [vmem:[%s1360_s1 + $0x60] sm:$0xff]  ;;  %v986_v9 = vld [vmem:[%s1360_s1 + $0x58] sm:$0xff]  ;;  %v977_v10 = vld [vmem:[%s1360_s1 + $0x10] sm:$0xff] }
  0x18   : > { %s1283_s18 = scalar_select %p380_p9, %s1118_s30, 1  ;;  %v985_v11 = vld [vmem:[%s1360_s1 + $0x50] sm:$0xff]  ;;  %v976_v12 = vld [vmem:[%s1360_s1 + $0x8] sm:$0xff]  ;;  %v975_v17 = vld [vmem:[%s1360_s1] sm:$0xff] }
  0x19   : > { %542 = vmatpush.bf16.msra.mxu0 %v981_v2  ;;  %s872_s24 = sshll.u32 %s1384_s10, 2  ;;  %v984_v13 = vld [vmem:[%s1360_s1 + $0x48] sm:$0xff]  ;;  %v983_v18 = vld [vmem:[%s1360_s1 + $0x40] sm:$0xff]  ;;  %v998_v29 = vld [vmem:[#allocation2 + $0x38] sm:$0xff] }
  0x1a   : > { %555 = vmatpush.bf16.msra.mxu1 %v989_v3  ;;  %s871_s23 = sshll.u32 %s1283_s18, 1  ;;  %v1054_v21 = vld [vmem:[%s1361_s2] ss:$0 sm:$0xff]  ;;  %673 = vmatpush.bf16.msra.mxu2 %v998_v29  ;;  %v997_v40 = vld [vmem:[#allocation2 + $0x30] sm:$0xff]  ;;  %v996_v41 = vld [vmem:[#allocation2 + $0x28] sm:$0xff] }
  0x1b   : > { %s384_s25 = sadd.s32 %s872_s24, %s871_s23  ;;  %v995_v42 = vld [vmem:[#allocation2 + $0x20] sm:$0xff]  ;;  %v994_v43 = vld [vmem:[#allocation2 + $0x18] sm:$0xff]  ;;  %v993_v44 = vld [vmem:[#allocation2 + $0x10] sm:$0xff] }
  0x1c   : > { %s873_s5 = sshll.u32 %s384_s25, 2  ;;  %v1059_v30 = vpop.eup %1058  ;;  %v992_v45 = vld [vmem:[#allocation2 + $0x8] sm:$0xff]  ;;  %v991_v46 = vld [vmem:[#allocation2] sm:$0xff]  ;;  %s874_s25 = sshll.u32 %s1384_s10, 1 }
  0x1d   : > { %543 = vmatpush.bf16.msra.mxu0 %v980_v4  ;;  %s386_s26 = scalar_lea.vmem %s1359_s0, %s873_s5  ;;  %v570_v31 = vmul.f32 128.0, %v1059_v30  ;;  %vm574_vm0 = vweird.f32 %v1059_v30  ;;  %v1055_v56 = vld [vmem:[%s1362_s3] ss:$0 sm:$0xff]  ;;  %s392_s14 = sadd.s32 %s874_s25, %s1283_s18 }
  0x1e   : > { %556 = vmatpush.bf16.msra.mxu1 %v988_v5  ;;  %v401_v14 = vld [vmem:[%s386_s26] sm:$0xff]  ;;  %674 = vmatpush.bf16.msra.mxu2 %v997_v40  ;;  %s875_s19 = sshll.u32 %s392_s14, 3 }
  0x1f   : > { %v439_v15 = vunpack.c.l.b16 %v401_v14  ;;  %v440_v16 = vunpack.c.h.b16 %v401_v14  ;;  %v571_v32 = vsub.f32 1.0, %v570_v31  ;;  %v1056_v59 = vld [vmem:[%s1363_s4] ss:$0 sm:$0xff]  ;;  %s394_s23 = scalar_lea.vmem %s1366_s7, %s875_s19 }
  0x20   : > { %v1057_v63 = vld [vmem:[%s1365_s6] ss:$0 sm:$0xff] }
  0x21   : > { %544 = vmatpush.bf16.msra.mxu0 %v979_v6  ;;  %v441_v19 = vpack.c.b16 %v439_v15, %v439_v15  ;;  %v442_v20 = vpack.c.b16 %v440_v16, %v440_v16  ;;  %v572_v33 = vmul.f32 %v1059_v30, %v571_v32 }
  0x22   : > { %557 = vmatpush.bf16.msra.mxu1 %v987_v7  ;;  %675 = vmatpush.bf16.msra.mxu2 %v996_v41 }
  0x23   : > { %v573_v34 = vadd.f32 %v1059_v30, %v572_v33 }
  0x25   : > { %545 = vmatpush.bf16.msra.mxu0 %v978_v8  ;;  %v575_v35 = vsel %vm574_vm0, %v1059_v30, %v573_v34 }
  0x26   : > { %558 = vmatpush.bf16.msra.mxu1 %v986_v9  ;;  %676 = vmatpush.bf16.msra.mxu2 %v995_v42 }
  0x29   : > { %546 = vmatpush.bf16.msra.mxu0 %v977_v10 }
  0x2a   : > { %559 = vmatpush.bf16.msra.mxu1 %v985_v11  ;;  %677 = vmatpush.bf16.msra.mxu2 %v994_v43 }
  0x2d   : > { %547 = vmatpush.bf16.msra.mxu0 %v976_v12 }
  0x2e   : > { %560 = vmatpush.bf16.msra.mxu1 %v984_v13  ;;  %678 = vmatpush.bf16.msra.mxu2 %v993_v44 }
  0x31   : > { %548 = vmatpush.bf16.msra.mxu0 %v975_v17 }
  0x32   : > { %561 = vmatpush.bf16.msra.mxu1 %v983_v18  ;;  %679 = vmatpush.bf16.msra.mxu2 %v992_v45 }
  0x34   : > { %549 = vmatmul.bf16.vlgmr.msra.gmra.mxu0 %v441_v19 }
  0x35   : > { %562 = vmatmul.bf16.vlgmr.msra.gmra.mxu1 %v442_v20 }
  0x36   : > { %680 = vmatpush.bf16.msra.mxu2 %v991_v46 }
  0xb1   : > { %v550_v22 = vpop.f32.mrf.mxu0 }
  0xb2   : > { %v563_v23 = vpop.f32.mrf.mxu1  ;;  %v551_v24 = vadd.f32 %v1054_v21, %v550_v22 }
  0xb4   : > { %v564_v25 = vadd.f32 %v563_v23, %v551_v24 }
  0xb6   : > { %567 = vadd.xlane.f32.xlu0 %v564_v25 }
  0xb9   : > { %v552_v26 = vpop.f32.mrf.mxu0 }
  0xba   : > { %v565_v27 = vpop.f32.mrf.mxu1 }
 0x129   : > { %v568_v36 = vpop.xlane.xlu0 %567 }
 0x12a   : > { %v576_v37 = vmul.f32 %v575_v35, %v568_v36 }
 0x12c   : > { %v577_v38 = vsub.f32 %v564_v25, %v576_v37 }
 0x12e   : > { %v578_v39 = vmul.f32 %v577_v38, %v577_v38 }
 0x130   : > { %579 = vadd.xlane.f32.xlu0 %v578_v39 }
 0x1a3   : > { %v580_v47 = vpop.xlane.xlu0 %579 }
 0x1a4   : > { %v581_v48 = vmul.f32 %v580_v47, %v575_v35 }
 0x1a6   : > { %v582_v49 = vadd.f32 1e-05, %v581_v48 }
 0x1a8   : > { %1060 = vrsqrt.f32 %v582_v49  ;;  %vm589_vm2 = vweird.f32 %v582_v49 }
 0x1ae   : > { %v1061_v50 = vpop.eup %1060 }
 0x1af   : > { %v584_v51 = vmul.f32 %v1061_v50, %v582_v49  ;;  %vm590_vm1 = vweird.f32 %v1061_v50 }
 0x1b0   : > { %vm591_vm3 = vmor %vm589_vm2, %vm590_vm1 }
 0x1b1   : > { %v585_v52 = vmul.f32 %v1061_v50, %v584_v51 }
 0x1b3   : > { %v586_v53 = vmul.f32 0.5, %v585_v52 }
 0x1b5   : > { %v587_v54 = vsub.f32 1.5, %v586_v53 }
 0x1b7   : > { %v588_v55 = vmul.f32 %v1061_v50, %v587_v54 }
 0x1b9   : > { %v592_v57 = vsel %vm591_vm3, %v1061_v50, %v588_v55 }
 0x1ba   : > { %v593_v58 = vmul.f32 %v592_v57, %v577_v38 }
 0x1bc   : > { %v598_v60 = vmul.f32 %v1055_v56, %v593_v58 }
 0x1be   : > { %v603_v61 = vadd.f32 %v1056_v59, %v598_v60 }
 0x1c0   : > { %v604_v62 = vpack.c.bf16 %v603_v61, %v603_v61 }
 0x1c2   : > { %681 = vmatmul.bf16.vlgmr.msra.gmra.mxu2 %v604_v62 }
 0x245   : > { %v682_v0 = vpop.f32.mrf.mxu2 }
 0x246   : > { %v683_v1 = vadd.f32 %v1057_v63, %v682_v0 }
 0x248   : > { %686 = vst [vmem:[%s394_s23] sm:$0xff] %v683_v1 }
 0x249   : > { %690 = sbr.rel (%p972_p10) target bundleno = 593 (0x251), region = 56 }
 0x24d   : > { %v684_v2 = vpop.f32.mrf.mxu2 }
 0x24e   : > { %v1140_v3 = vmov 0.0  }
 0x24f   : > { %691 = vst [vmem:[%s1255_s28] sm:$0x1] %v1140_v3 }
 0x250   : > { %692 = vst [vmem:[%s1261_s17] sm:$0x1] %v1140_v3 }
 0x251 PF: > { %v694_v4 = vrot.slane %v683_v1, 4  ;;  %v703_v5 = vmul.f32 %v683_v1, %v683_v1 }
 0x253   : > { %v695_v6 = vadd.f32 %v694_v4, %v683_v1  ;;  %v704_v7 = vrot.slane %v703_v5, 4 }
 0x255   : > { %v696_v8 = vrot.slane %v695_v6, 2  ;;  %v705_v9 = vadd.f32 %v704_v7, %v703_v5 }
 0x256   : > { %v693_v14 = vld [vmem:[%s1255_s28] sm:$0x1] }
 0x257   : > { %v697_v10 = vadd.f32 %v696_v8, %v695_v6  ;;  %v706_v11 = vrot.slane %v705_v9, 2  ;;  %v702_v17 = vld [vmem:[%s1261_s17] sm:$0x1] }
 0x259   : > { %v698_v12 = vrot.slane %v697_v10, 1  ;;  %v707_v13 = vadd.f32 %v706_v11, %v705_v9 }
 0x25b   : > { %v699_v15 = vadd.f32 %v698_v12, %v697_v10  ;;  %v708_v16 = vrot.slane %v707_v13, 1 }
 0x25d   : > { %v700_v18 = vadd.f32 %v699_v15, %v693_v14  ;;  %v709_v19 = vadd.f32 %v708_v16, %v707_v13 }
 0x25f   : > { %701 = vst [vmem:[%s1255_s28] sm:$0x1] %v700_v18  ;;  %v710_v20 = vadd.f32 %v709_v19, %v702_v17 }
 0x261   : > { %711 = vst [vmem:[%s1261_s17] sm:$0x1] %v710_v20 }
 0x262 PF: > { %s21_s13 = sadd.s32 1, %s1134_s13   ;;  %s1373_s30 = smov %s1126_s11 }
 0x263   : > { %p18_p11 = scmp.ge.s32.totalorder %s21_s13, 6   ;;  %s1374_s10 = smov %s1130_s12 }
 0x264   : > { %s1375_s11 = smov %s1378_s15  ;;  %s1376_s12 = smov %s1382_s16 }
 0x265   :  { %20 = sbr.rel (!%p18_p11) target bundleno = 5 (0x5), region = 111 }
 0x26a   :  { %763 = vsyncpa [#allocation3], 1 }
 0x26b   :  { %765 = vsyncpa [#allocation3 + $0x1], 1 }

</bundles_post_ra>
